<compile_context>
chip_gen: v7x
topology: tpu7x:2x2x1
jax: 0.10.0
libtpu: 0.0.40
codegen_flags: <defaults>
</compile_context>

<pallas_src>
import jax
import jax.numpy as jnp
from jax.experimental import pallas as pl
from jax.experimental.pallas import tpu as pltpu


def _normalize_kernel(x_ref, o_ref):
    # x_ref: (tile_rows, H*W) block in VMEM.
    x = x_ref[...]
    x_abs = jnp.abs(x)
    min_val = jnp.min(x_abs, axis=-1, keepdims=True)          # (tile_rows, 1)
    max_val = jnp.max(x_abs, axis=-1, keepdims=True)          # (tile_rows, 1)
    inv = pl.reciprocal(max_val - min_val + 1e-8, approx=False)
    o_ref[...] = ((x - min_val) * inv).astype(o_ref.dtype)


def _choose_tile_rows(rows: int, cols: int, dtype, vmem_block_budget_bytes: int) -> int:
    dtype_bytes = jnp.dtype(dtype).itemsize
    # Sublane packing: f32 -> 8, bf16/f16 -> 16, int8/fp8 -> 32.
    sublane = {4: 8, 2: 16, 1: 32}.get(dtype_bytes, 8)
    row_bytes = cols * dtype_bytes
    # TODO(synk): if a single row (H*W) exceeds the VMEM block budget, switch to
    # a column-tiled two-pass running-min/max scheme; not needed for these shapes.
    max_tile_rows = max(sublane, vmem_block_budget_bytes // max(row_bytes, 1))
    if rows <= max_tile_rows:
        # Block equals the full row extent -> exempt from the 8-divisibility rule.
        return rows
    return max(sublane, (max_tile_rows // sublane) * sublane)


def normalize_batch(x: jax.Array, vmem_block_budget_bytes: int = 4 * 1024 * 1024) -> jax.Array:
    """Pallas equivalent of NormalizeBatch.forward for a 5-D (B,S,C,H,W) input."""
    assert x.ndim == 5, "expected (B, S, C, H, W)"
    B, S, C, H, W = x.shape
    rows = B * S * C
    cols = H * W
    x2 = x.reshape(rows, cols)

    tile_rows = _choose_tile_rows(rows, cols, x.dtype, vmem_block_budget_bytes)
    grid = (pl.cdiv(rows, tile_rows),)

    out = pl.pallas_call(
        _normalize_kernel,
        out_shape=jax.ShapeDtypeStruct((rows, cols), x.dtype),
        grid_spec=pltpu.PrefetchScalarGridSpec(
            num_scalar_prefetch=0,
            grid=grid,
            in_specs=[pl.BlockSpec((tile_rows, cols), lambda i: (i, 0))],
            out_specs=pl.BlockSpec((tile_rows, cols), lambda i: (i, 0)),
        ),
        compiler_params=pltpu.CompilerParams(
            dimension_semantics=("parallel",),
        ),
    )(x2)

    return out.reshape(B, S, C, H, W)


def _reference(x: jax.Array) -> jax.Array:
    # Pure-JAX reference mirroring the PyTorch module semantics.
    x_abs = jnp.abs(x)
    mn = jnp.min(x_abs, axis=(-2, -1), keepdims=True)
    mx = jnp.max(x_abs, axis=(-2, -1), keepdims=True)
    return (x - mn) / (mx - mn + 1e-8)


if __name__ == "__main__":
    key = jax.random.PRNGKey(0)
    B, S, C, H, W = 2, 3, 4, 16, 16  # small 5-D batch of NCHW samples
    x = jax.random.normal(key, (B, S, C, H, W), dtype=jnp.float32)

    # 1) default path: whole row set fits in one block.
    y = jax.block_until_ready(normalize_batch(x))
    y_ref = _reference(x)
    assert y.shape == x.shape
    assert jnp.allclose(y, y_ref, atol=1e-5, rtol=1e-5), "mismatch vs reference (single block)"

    # 2) force a multi-step grid with a partial last block (rows=24, tile=16)
    #    to exercise the un-padded pl.cdiv path.
    y2 = jax.block_until_ready(normalize_batch(x, vmem_block_budget_bytes=16 * 256 * 4))
    assert jnp.allclose(y2, y_ref, atol=1e-5, rtol=1e-5), "mismatch vs reference (partial block)"

    print("KERNEL_OK")
</pallas_src>

<mosaic_0001>
module attributes {stable_mosaic.version = 11 : i64} {
  func.func @_normalize_kernel(%arg0: i32, %arg1: memref<24x256xf32, #tpu.memory_space<vmem>>, %arg2: memref<24x256xf32, #tpu.memory_space<vmem>>) attributes {dimension_semantics = [#tpu.dimension_semantics<parallel>], iteration_bounds = array<i64: 1>, scalar_prefetch = 0 : i64, scratch_operands = 0 : i64, tpu.core_type = #tpu.core_type<tc>, window_params = [{transform_indices = @transform_0, window_bounds = array<i64: 24, 256>}, {transform_indices = @transform_1, window_bounds = array<i64: 24, 256>}]} {
    %c0 = arith.constant 0 : index
    %c0_0 = arith.constant 0 : index
    %0 = vector.load %arg1[%c0, %c0_0] : memref<24x256xf32, #tpu.memory_space<vmem>>, vector<24x256xf32>
    %1 = math.absf %0 : vector<24x256xf32>
    %cst = arith.constant dense<0x7F800000> : vector<24xf32>
    %2 = vector.multi_reduction <minimumf>, %1, %cst [1] : vector<24x256xf32> to vector<24xf32>
    %3 = vector.shape_cast %2 : vector<24xf32> to vector<24x1xf32>
    %cst_1 = arith.constant dense<0xFF800000> : vector<24xf32>
    %4 = vector.multi_reduction <maximumf>, %1, %cst_1 [1] : vector<24x256xf32> to vector<24xf32>
    %5 = vector.shape_cast %4 : vector<24xf32> to vector<24x1xf32>
    %6 = arith.subf %5, %3 : vector<24x1xf32>
    %cst_2 = arith.constant 9.99999993E-9 : f32
    %7 = vector.broadcast %cst_2 : f32 to vector<24x1xf32>
    %8 = arith.addf %6, %7 : vector<24x1xf32>
    %9 = tpu.reciprocal %8 : vector<24x1xf32> -> vector<24x1xf32>
    %10 = vector.broadcast %3 : vector<24x1xf32> to vector<24x256xf32>
    %11 = arith.subf %0, %10 : vector<24x256xf32>
    %12 = vector.broadcast %9 : vector<24x1xf32> to vector<24x256xf32>
    %13 = arith.mulf %11, %12 : vector<24x256xf32>
    %c0_3 = arith.constant 0 : index
    %c0_4 = arith.constant 0 : index
    %14 = vector.load %arg2[%c0_3, %c0_4] : memref<24x256xf32, #tpu.memory_space<vmem>>, vector<24x256xf32>
    tpu.vector_store %arg2[%c0_3, %c0_4], %13 {strides = array<i32>} : memref<24x256xf32, #tpu.memory_space<vmem>>, vector<24x256xf32>,
    return
  }
  func.func @transform_0(%arg0: i32) -> (i32, i32) {
    %c0_i32 = arith.constant 0 : i32
    %c0_i32_0 = arith.constant 0 : i32
    return %arg0, %c0_i32 : i32, i32
  }
  func.func @transform_1(%arg0: i32) -> (i32, i32) {
    %c0_i32 = arith.constant 0 : i32
    %c0_i32_0 = arith.constant 0 : i32
    return %arg0, %c0_i32 : i32, i32
  }
}

</mosaic_0001>

<bundles_post_ra>
// kernel: tpu_custom_call.1
= control target key start
LH: loop header
LB: loop body
LE: loop exit
PB: predicated region body
PF: predicated region fallthrough
CT: control target
= control target key end

     0   :  { %6 = vsyncpa [#allocation3], 0  ;;  %s199_s0 = inlined_call_operand.hbm [shape: f32[24,256], index: 0, kind: input, shape index: {}]   ;;  %s200_s1 = inlined_call_operand.hbm [shape: f32[24,256], index: 1, kind: output, shape index: {}]  }
   0x1   :  { %7 = vsyncpa [#allocation4], 0  ;;  %s155_s6 = smov [#allocation2]   ;;  %s107_s10 = scalar_lea.hbm %s199_s0, 768 }
   0x2   :  { %s13_s7 = sshll.u32 %s155_s6, 4  ;;  %p108_p0 = scmp.ne.s32.totalorder %s199_s0, %s107_s10  ;;  %s14_s7 = int_to_ptr.vmem [resolvable:$true] %s13_s7 }
   0x3   :  { %p111_p1 = scmp.lt.u32.totalorder %s107_s10, %s199_s0 }
   0x5   :  { %p113_p2 = pnand %p111_p1, %p108_p0 }
   0x7   :  { %116 = shalt.err (!%p113_p2)
}
   0x8   :  { %s117_s15 = scalar_lea.vmem %s14_s7, 768  ;;  %p122_p4 = scmp.lt.s32.totalorder %s14_s7, %s14_s7 }
   0x9   :  { %p118_p3 = scmp.ne.s32.totalorder %s14_s7, %s117_s15  ;;  %p123_p5 = scmp.lt.s32.totalorder %s117_s15, %s117_s15 }
   0xb   :  { %p124_p6 = por %p123_p5, %p122_p4 }
   0xd   :  { %p125_p7 = pnand %p124_p6, %p118_p3 }
   0xf   :  { %128 = shalt.err (!%p125_p7)
}
  0x10   :  { %s156_s16 = smov 256   ;;  %s157_s17 = smov 16  }
  0x11   :  { %19 = dma.hbm_to_vmem [thread:$0]  %s199_s0, 768, %s14_s7, [#allocation3], %s156_s16, %s156_s16, %s157_s17  }
  0x12   :  { %151 = dma.done.wait [#allocation3], 768  }
  0x13   :  { %152 = vsyncadd [#allocation3], 4294966528  ;;  %v27_v0 = vld [vmem:[#allocation2 + $0x20] sm:$0xff]  ;;  %v28_v1 = vld [vmem:[#allocation2 + $0x28] sm:$0xff]  ;;  %s158_s0 = smov [#allocation5]  }
  0x14   :  { %v23_v2 = vld [vmem:[#allocation2] sm:$0xff]  ;;  %v33_v3 = vand.u32 2147483647, %v27_v0  ;;  %v34_v4 = vand.u32 2147483647, %v28_v1  ;;  %v24_v5 = vld [vmem:[#allocation2 + $0x8] sm:$0xff] }
  0x15   :  { %v25_v6 = vld [vmem:[#allocation2 + $0x10] sm:$0xff]  ;;  %v29_v7 = vand.u32 2147483647, %v23_v2  ;;  %v30_v8 = vand.u32 2147483647, %v24_v5  ;;  %v26_v9 = vld [vmem:[#allocation2 + $0x18] sm:$0xff] }
  0x16   :  { %v41_v10 = vmin.f32 %v33_v3, %v34_v4  ;;  %v31_v11 = vand.u32 2147483647, %v25_v6  ;;  %v32_v12 = vand.u32 2147483647, %v26_v9  ;;  %v50_v16 = vmax.f32 %v33_v3, %v34_v4  ;;  %s85_s20 = sshll.u32 %s158_s0, 4  ;;  %s86_s20 = int_to_ptr.vmem [resolvable:$true] %s85_s20 }
  0x17   :  { %v35_v13 = vmin.f32 %v29_v7, %v30_v8  ;;  %v44_v14 = vmax.f32 %v29_v7, %v30_v8  ;;  %s129_s21 = scalar_lea.vmem %s86_s20, 768  ;;  %p134_p9 = scmp.lt.s32.totalorder %s86_s20, %s86_s20 }
  0x18   :  { %42 = vmin.xlane.f32.xlu1 %v41_v10  ;;  %v38_v15 = vmin.f32 %v31_v11, %v32_v12  ;;  %v47_v17 = vmax.f32 %v31_v11, %v32_v12  ;;  %p130_p8 = scmp.ne.s32.totalorder %s86_s20, %s129_s21  ;;  %p135_p10 = scmp.lt.s32.totalorder %s129_s21, %s129_s21 }
  0x19   :  { %36 = vmin.xlane.f32.xlu0 %v35_v13 }
  0x1a   :  { %p136_p11 = por %p135_p10, %p134_p9 }
  0x1c   :  { %45 = vmax.xlane.f32.xlu1 %v44_v14  ;;  %p137_p12 = pnand %p136_p11, %p130_p8 }
  0x1d   :  { %39 = vmin.xlane.f32.xlu0 %v38_v15 }
  0x20   :  { %51 = vmax.xlane.f32.xlu1 %v50_v16 }
  0x21   :  { %48 = vmax.xlane.f32.xlu0 %v47_v17 }
  0xa5   :  { %v43_v18 = vpop.xlane.xlu1 %42 }
  0xa6   :  { %v37_v19 = vpop.xlane.xlu0 %36  ;;  %v66_v35 = vsub.f32 %v27_v0, %v43_v18  ;;  %v67_v36 = vsub.f32 %v28_v1, %v43_v18 }
  0xa7   :  { %v62_v30 = vsub.f32 %v23_v2, %v37_v19  ;;  %v63_v31 = vsub.f32 %v24_v5, %v37_v19 }
  0xa9   :  { %v46_v20 = vpop.xlane.xlu1 %45 }
  0xaa   :  { %v53_v21 = vsub.f32 %v46_v20, %v37_v19  ;;  %v40_v22 = vpop.xlane.xlu0 %39 }
  0xab   :  { %v64_v38 = vsub.f32 %v25_v6, %v40_v22  ;;  %v65_v39 = vsub.f32 %v26_v9, %v40_v22 }
  0xac   :  { %v56_v23 = vadd.f32 1e-08, %v53_v21 }
  0xad   :  { %v52_v24 = vpop.xlane.xlu1 %51 }
  0xae   :  { %101 = vrcp.f32 %v56_v23  ;;  %v55_v25 = vsub.f32 %v52_v24, %v43_v18  ;;  %v49_v26 = vpop.xlane.xlu0 %48 }
  0xaf   :  { %v54_v27 = vsub.f32 %v49_v26, %v40_v22 }
  0xb0   :  { %v58_v28 = vadd.f32 1e-08, %v55_v25 }
  0xb1   :  { %v57_v29 = vadd.f32 1e-08, %v54_v27 }
  0xb2   :  { %103 = vrcp.f32 %v58_v28 }
  0xb3   :  { %105 = vrcp.f32 %v57_v29 }
  0xb8   :  { %v102_v32 = vpop.eup %101 }
  0xb9   :  { %v68_v33 = vmul.f32 %v102_v32, %v62_v30  ;;  %v69_v34 = vmul.f32 %v102_v32, %v63_v31 }
  0xbb   :  { %74 = vst [vmem:[#allocation5] sm:$0xff] %v68_v33  ;;  %75 = vst [vmem:[#allocation5 + $0x8] sm:$0xff] %v69_v34 }
  0xbc   :  { %v104_v37 = vpop.eup %103 }
  0xbd   :  { %v106_v40 = vpop.eup %105  ;;  %v72_v41 = vmul.f32 %v104_v37, %v66_v35  ;;  %v73_v42 = vmul.f32 %v104_v37, %v67_v36 }
  0xbe   :  { %v70_v43 = vmul.f32 %v106_v40, %v64_v38  ;;  %v71_v44 = vmul.f32 %v106_v40, %v65_v39 }
  0xbf   :  { %78 = vst [vmem:[#allocation5 + $0x20] sm:$0xff] %v72_v41  ;;  %79 = vst [vmem:[#allocation5 + $0x28] sm:$0xff] %v73_v42 }
  0xc0   :  { %76 = vst [vmem:[#allocation5 + $0x10] sm:$0xff] %v70_v43  ;;  %77 = vst [vmem:[#allocation5 + $0x18] sm:$0xff] %v71_v44 }
  0xc1   :  { %140 = shalt.err (!%p137_p12)
}
  0xc2   :  { %s141_s24 = scalar_lea.hbm %s200_s1, 768 }
  0xc3   :  { %p142_p13 = scmp.ne.s32.totalorder %s200_s1, %s141_s24  ;;  %p145_p0 = scmp.lt.u32.totalorder %s141_s24, %s200_s1 }
  0xc5   :  { %p147_p1 = pnand %p145_p0, %p142_p13 }
  0xc7   :  { %150 = shalt.err (!%p147_p1)
}
  0xc8   :  { %91 = dma.vmem_to_hbm [thread:$0]  %s86_s20, 768, %s200_s1, [#allocation4], %s156_s16, %s156_s16, %s157_s17  }
  0xc9   :  { %153 = dma.done.wait [#allocation4], 768  }
  0xca   :  { %154 = vsyncadd [#allocation4], 4294966528 }
  0xcb   :  { %95 = vsyncpa [#allocation3], 1 }
  0xcc   :  { %96 = vsyncpa [#allocation4], 1 }

</bundles_post_ra>
